<compile_context>
chip_gen: v5e
topology: v5e:2x2
jax: 0.10.0
libtpu: 0.0.40
codegen_flags: <defaults>
</compile_context>

<pallas_src>
import functools

import jax
import jax.numpy as jnp
from jax import lax
from jax.experimental import pallas as pl
from jax.experimental.pallas import tpu as pltpu


# --------------------------------------------------------------------------
# In-kernel helpers
# --------------------------------------------------------------------------
def _sigmoid_cast(logits_f32, out_dtype):
    """sigmoid in f32, cast at the store.

    For 16-bit outputs use exp(-x) + approx EUP reciprocal: the approx vrcp
    error (~1e-4 rel) is below bf16/f16 output precision, and it roughly
    halves EUP cycles (the binding slot on v6e/v7x once writeback is bf16).
    """
    out_dtype = jnp.dtype(out_dtype)
    if out_dtype.itemsize < 4:
        return pl.reciprocal(1.0 + jnp.exp(-logits_f32), approx=True).astype(out_dtype)
    return jax.nn.sigmoid(logits_f32).astype(out_dtype)


# --------------------------------------------------------------------------
# Kernels
# --------------------------------------------------------------------------
def _ipd_zresident_kernel(z_ref, a_ref, *, gi, tu, tv):
    """One (TU, TV) output tile; full (Up, C) z slab resident for this batch.

    z_ref: (Up, C)   a_ref: (TU, TV)
    grid = (N * gi, gj); i = program_id(0) % gi, j = program_id(1).
    """
    i = pl.program_id(0) % gi
    j = pl.program_id(1)
    row = z_ref[pl.ds(pl.multiple_of(i * tu, 128), tu), :]
    col = z_ref[pl.ds(pl.multiple_of(j * tv, 128), tv), :]
    logits = lax.dot_general(
        row, col,
        dimension_numbers=(((1,), (1,)), ((), ())),   # contract C on both sides
        preferred_element_type=jnp.float32,
    )
    a_ref[...] = _sigmoid_cast(logits, a_ref.dtype)


def _ipd_rowcol_kernel(z_row_ref, z_col_ref, a_ref):
    """One (TU, TV) output tile from separate row/col z tiles (large-C fallback).

    z_row_ref: (TU, C)   z_col_ref: (TV, C)   a_ref: (TU, TV)
    """
    logits = lax.dot_general(
        z_row_ref[...], z_col_ref[...],
        dimension_numbers=(((1,), (1,)), ((), ())),
        preferred_element_type=jnp.float32,
    )
    a_ref[...] = _sigmoid_cast(logits, a_ref.dtype)


def _ipd_batched_kernel(z_ref, a_ref):
    """Whole (U, U) adjacency for NB small batch elements per grid step.

    z_ref: (NB, U, C)   a_ref: (NB, U, U)
    """
    z = z_ref[...]
    logits = lax.dot_general(
        z, z,
        dimension_numbers=(((2,), (2,)), ((0,), (0,))),  # batched, contract C
        preferred_element_type=jnp.float32,
    )
    # TODO(synk): for lane-sparse U (< 128) a flattened (NB, U*U) output block
    # would give denser stores; the in-kernel reshape relayout needs a verified
    # bundle-level win before enabling it.
    a_ref[...] = _sigmoid_cast(logits, a_ref.dtype)


# --------------------------------------------------------------------------
# Tiling helpers
# --------------------------------------------------------------------------
def _pick_uv_tile(Up, C, z_bytes, out_bytes, z_resident,
                  cap=1024, vmem_budget=36 * 1024 * 1024):
    """Largest multiple of 128 that divides Up, <= cap, and fits the VMEM budget."""
    t = (min(cap, Up) // 128) * 128
    while t >= 128:
        if Up % t == 0:
            out_db = 2 * t * t * out_bytes          # double-buffered output tile
            temps = 3 * t * t * 4                    # f32 logits + elementwise temps
            if z_resident:
                ins = 2 * Up * C * z_bytes           # double-buffered full z slab
            else:
                ins = 2 * 2 * t * C * z_bytes        # two double-buffered tiles
            if out_db + temps + ins <= vmem_budget:
                return t
        t -= 128
    return 128


def _pick_batch_block(N, U, C, z_bytes, out_bytes, budget=6 * 1024 * 1024):
    """Batch elements per grid step on the small-U path (v5e-safe budget)."""
    per = (2 * U * C * z_bytes      # double-buffered input
           + 2 * U * U * out_bytes  # double-buffered output
           + 2 * U * U * 4)         # f32 logits + sigmoid intermediates
    nb = max(1, min(N, budget // max(per, 1)))
    while N % nb:
        nb -= 1
    return nb


# --------------------------------------------------------------------------
# pallas_call builders
# --------------------------------------------------------------------------
def _tiled_call(z, N, Up, C, T, out_dtype, z_resident):
    GI = Up // T
    GJ = Up // T
    grid = (N * GI, GJ)  # fold (n, i) so megacore shards a large axis

    if z_resident:
        kernel = functools.partial(_ipd_zresident_kernel, gi=GI, tu=T, tv=T)
        in_specs = [pl.BlockSpec((pl.Squeezed(), Up, C),
                                 lambda ij, j: (ij // GI, 0, 0))]
        operands = (z,)
    else:
        kernel = _ipd_rowcol_kernel
        in_specs = [
            pl.BlockSpec((pl.Squeezed(), T, C),
                         lambda ij, j: (ij // GI, ij % GI, 0)),
            pl.BlockSpec((pl.Squeezed(), T, C),
                         lambda ij, j: (ij // GI, j, 0)),
        ]
        operands = (z, z)

    out_specs = pl.BlockSpec((pl.Squeezed(), T, T),
                             lambda ij, j: (ij // GI, ij % GI, j))

    return pl.pallas_call(
        kernel,
        out_shape=jax.ShapeDtypeStruct((N, Up, Up), out_dtype),
        grid_spec=pltpu.PrefetchScalarGridSpec(
            num_scalar_prefetch=0,
            grid=grid,
            in_specs=in_specs,
            out_specs=out_specs,
        ),
        compiler_params=pltpu.CompilerParams(
            dimension_semantics=("parallel", "parallel"),
            vmem_limit_bytes=48 * 1024 * 1024,   # < v7x 64 MiB physical VMEM
        ),
    )(*operands)


def _batched_call(z, N, U, C, out_dtype):
    NB = _pick_batch_block(N, U, C, z.dtype.itemsize,
                           jnp.dtype(out_dtype).itemsize)
    grid = (N // NB,)
    return pl.pallas_call(
        _ipd_batched_kernel,
        out_shape=jax.ShapeDtypeStruct((N, U, U), out_dtype),
        grid_spec=pltpu.PrefetchScalarGridSpec(
            num_scalar_prefetch=0,
            grid=grid,
            in_specs=[pl.BlockSpec((NB, U, C), lambda n: (n, 0, 0))],
            out_specs=pl.BlockSpec((NB, U, U), lambda n: (n, 0, 0)),
        ),
        compiler_params=pltpu.CompilerParams(
            dimension_semantics=("parallel",)),
    )(z)


# --------------------------------------------------------------------------
# Wrapper
# --------------------------------------------------------------------------
def inner_product_decoder(z, dropout: float = 0.0, *,
                          out_dtype=None,
                          compute_dtype=None,
                          tile_cap: int = 1024,
                          small_path_limit_bytes: int = 2 * 1024 * 1024,
                          z_resident_limit_bytes: int = 2 * 1024 * 1024):
    """z: (N, U, C) -> A: (N, U, U) = sigmoid(z @ z^T) per batch element.

    Perf note: the kernel is HBM-writeback bound; pass out_dtype=jnp.bfloat16
    for ~2x wall-clock (f32 accumulation is kept; the cast happens only at the
    final store).  compute_dtype=jnp.bfloat16 additionally halves input DMA.
    """
    # TODO(synk): dropout > 0 needs pltpu.prng_* masking of z (both matmul
    # operands) before the contraction; p == 0.0 (eval mode) is the identity.
    assert dropout == 0.0, "dropout > 0 not implemented in-kernel"

    if compute_dtype is not None:
        z = z.astype(compute_dtype)

    N, U, C = z.shape
    out_dtype = jnp.dtype(out_dtype) if out_dtype is not None else z.dtype
    z_bytes = z.dtype.itemsize
    o_bytes = jnp.dtype(out_dtype).itemsize

    # Small-U path: whole (U, U) per element, several elements per grid step.
    if U % 128 != 0 and U * U * 4 <= small_path_limit_bytes:
        return _batched_call(z, N, U, C, out_dtype)

    # Tiled path; pad U up to a multiple of 128 if needed (output sliced back).
    Up = ((U + 127) // 128) * 128
    zp = z if Up == U else jnp.pad(z, ((0, 0), (0, Up - U), (0, 0)))
    z_resident = Up * C * z_bytes <= z_resident_limit_bytes
    T = _pick_uv_tile(Up, C, z_bytes, o_bytes, z_resident, cap=tile_cap)
    A = _tiled_call(zp, N, Up, C, T, out_dtype, z_resident)
    if Up != U:
        A = A[:, :U, :U]
    return A


# --------------------------------------------------------------------------
# Self-test
# --------------------------------------------------------------------------
if __name__ == "__main__":
    def _ref(z):
        return jax.nn.sigmoid(jnp.einsum("nuc,nvc->nuv",
                                         z.astype(jnp.float32),
                                         z.astype(jnp.float32)))

    key = jax.random.PRNGKey(0)

    # 1) Module-scale shapes: batch=2, nodes(seq)=8, hidden=32 -> small-U path.
    N, U, C = 2, 8, 32
    z_small = jax.random.normal(key, (N, U, C), dtype=jnp.float32)
    A = jax.block_until_ready(inner_product_decoder(z_small))
    assert A.shape == (N, U, U)
    assert jnp.allclose(A, _ref(z_small), atol=1e-5, rtol=1e-5)

    # 2) Tiled z-resident path (U % 128 == 0), f32 output (exact sigmoid).
    z2 = jax.random.normal(jax.random.PRNGKey(1), (2, 256, 32), jnp.float32)
    A2 = jax.block_until_ready(inner_product_decoder(z2))
    assert A2.shape == (2, 256, 256)
    assert jnp.allclose(A2, _ref(z2), atol=1e-5, rtol=1e-5)

    # 3) Tiled path, multi-tile grid, bf16 output (approx-EUP sigmoid branch).
    A3 = jax.block_until_ready(
        inner_product_decoder(z2, out_dtype=jnp.bfloat16, tile_cap=128))
    assert A3.dtype == jnp.bfloat16
    assert jnp.allclose(A3.astype(jnp.float32), _ref(z2), atol=2e-2, rtol=2e-2)

    # 4) Padded tiled path (U not a multiple of 128), output sliced back.
    z4 = jax.random.normal(jax.random.PRNGKey(2), (1, 160, 32), jnp.float32)
    A4 = jax.block_until_ready(
        inner_product_decoder(z4, small_path_limit_bytes=0))
    assert A4.shape == (1, 160, 160)
    assert jnp.allclose(A4, _ref(z4), atol=1e-5, rtol=1e-5)

    # 5) Two-stream row/col tiled fallback (z slab forced non-resident).
    z5 = jax.random.normal(jax.random.PRNGKey(3), (1, 256, 32), jnp.float32)
    A5 = jax.block_until_ready(
        inner_product_decoder(z5, z_resident_limit_bytes=0))
    assert jnp.allclose(A5, _ref(z5), atol=1e-5, rtol=1e-5)

    print("KERNEL_OK")
</pallas_src>

<mosaic_0001>
module attributes {stable_mosaic.version = 11 : i64} {
  func.func @_ipd_batched_kernel(%arg0: i32, %arg1: memref<2x8x32xf32, #tpu.memory_space<vmem>>, %arg2: memref<2x8x8xf32, #tpu.memory_space<vmem>>) attributes {dimension_semantics = [#tpu.dimension_semantics<parallel>], iteration_bounds = array<i64: 1>, scalar_prefetch = 0 : i64, scratch_operands = 0 : i64, tpu.core_type = #tpu.core_type<tc>, window_params = [{transform_indices = @transform_0, window_bounds = array<i64: 2, 8, 32>}, {transform_indices = @transform_1, window_bounds = array<i64: 2, 8, 8>}]} {
    %c0 = arith.constant 0 : index
    %c0_0 = arith.constant 0 : index
    %c0_1 = arith.constant 0 : index
    %0 = vector.load %arg1[%c0, %c0_0, %c0_1] : memref<2x8x32xf32, #tpu.memory_space<vmem>>, vector<2x8x32xf32>
    %cst = arith.constant dense<0.000000e+00> : vector<2x8x8xf32>
    %1 = tpu.matmul %0, %0, %cst {dimension_numbers = #tpu.dot_dimension_numbers<[2], [2], [1], [1], [0, 0, 0, 1, 1, 1], [0], [0]>} : vector<2x8x32xf32>, vector<2x8x32xf32>, vector<2x8x8xf32> -> vector<2x8x8xf32>
    %2 = arith.negf %1 : vector<2x8x8xf32>
    %3 = math.exp %2 : vector<2x8x8xf32>
    %cst_2 = arith.constant 1.000000e+00 : f32
    %4 = vector.broadcast %cst_2 : f32 to vector<2x8x8xf32>
    %5 = arith.addf %4, %3 : vector<2x8x8xf32>
    %6 = arith.divf %4, %5 : vector<2x8x8xf32>
    %c0_3 = arith.constant 0 : index
    %c0_4 = arith.constant 0 : index
    %c0_5 = arith.constant 0 : index
    %7 = vector.load %arg2[%c0_3, %c0_4, %c0_5] : memref<2x8x8xf32, #tpu.memory_space<vmem>>, vector<2x8x8xf32>
    tpu.vector_store %arg2[%c0_3, %c0_4, %c0_5], %6 {strides = array<i32>} : memref<2x8x8xf32, #tpu.memory_space<vmem>>, vector<2x8x8xf32>,
    return
  }
  func.func @transform_0(%arg0: i32) -> (i32, i32, i32) {
    %c0_i32 = arith.constant 0 : i32
    %c0_i32_0 = arith.constant 0 : i32
    %c0_i32_1 = arith.constant 0 : i32
    return %arg0, %c0_i32, %c0_i32_0 : i32, i32, i32
  }
  func.func @transform_1(%arg0: i32) -> (i32, i32, i32) {
    %c0_i32 = arith.constant 0 : i32
    %c0_i32_0 = arith.constant 0 : i32
    %c0_i32_1 = arith.constant 0 : i32
    return %arg0, %c0_i32, %c0_i32_0 : i32, i32, i32
  }
}

</mosaic_0001>

<bundles_post_ra>
// kernel: tpu_custom_call.1
= control target key start
LH: loop header
LB: loop body
LE: loop exit
PB: predicated region body
PF: predicated region fallthrough
CT: control target
= control target key end

     0   :  { %6 = vsyncpa [#allocation3], 0  ;;  %s230_s0 = inlined_call_operand.hbm [shape: f32[2,8,32], index: 0, kind: input, shape index: {}]   ;;  %s231_s1 = inlined_call_operand.hbm [shape: f32[2,8,8], index: 1, kind: output, shape index: {}]  }
   0x1   :  { %7 = vsyncpa [#allocation4], 0  ;;  %s12_s8 = sshll.u32 %s230_s0, 4  ;;  %s204_s9 = smov [#allocation2]   ;;  %s13_s8 = int_to_ptr.hbm [resolvable:$true] %s12_s8 }
   0x2   :  { %s14_s10 = sshll.u32 %s204_s9, 4  ;;  %s205_s11 = smov 128   ;;  %s15_s10 = int_to_ptr.vmem [resolvable:$true] %s14_s10 }
   0x3   :  { %s206_s12 = smov 8  }
   0x4   :  { %20 = dma.hbm_to_vmem [thread:$0]  %s13_s8, 256, %s15_s10, [#allocation3], %s205_s11, %s205_s11, %s206_s12  }
   0x5   :  { %200 = dma.done.wait [#allocation3], 256  }
   0x6   :  { %201 = vsyncadd [#allocation3], 4294967040  ;;  %vm27_vm0 = vcmask 261120   ;;  %v25_v0 = vld [vmem:[#allocation2] sm:$0xff]  ;;  %v26_v1 = vld [vmem:[#allocation2 + $0x8] sm:$0xff]  ;;  %s207_s0 = smov [#allocation5]  }
   0x7   :  { %134 = vmatpush.xpose.msk.msra.mxu0 %vm27_vm0, %v25_v0  ;;  %136 = vmatpush.xpose.msk.msra.mxu1 %vm27_vm0, %v26_v1  ;;  %s119_s13 = sshll.u32 %s207_s0, 4  ;;  %s121_s16 = sshll.u32 %s231_s1, 4  ;;  %vm112_vm6 = vcmask 64512   ;;  %s120_s13 = int_to_ptr.vmem [resolvable:$true] %s119_s13  ;;  %s122_s16 = int_to_ptr.hbm [resolvable:$true] %s121_s16 }
   0xa   :  { %135 = vmatmul.msk.f32.vlgmr.msra.gmra.mxu0 %vm27_vm0, %v25_v0  ;;  %137 = vmatmul.msk.f32.vlgmr.msra.gmra.mxu1 %vm27_vm0, %v26_v1 }
  0x87   :  { %v48_v2 = vpop.f32.mrf.mxu0  ;;  %v71_v3 = vpop.f32.mrf.mxu1 }
  0x88   :  { %v138_v4 = vmul.f32 -1.442695, %v48_v2  ;;  %v139_v5 = vmul.f32 -1.442695, %v71_v3 }
  0x8a   :  { %144 = vpow2.f32 %v138_v4 }
  0x8b   :  { %146 = vpow2.f32 %v139_v5 }
  0x90   :  { %v145_v6 = vpop.eup %144 }
  0x91   :  { %v147_v7 = vpop.eup %146  ;;  %v80_v8 = vadd.f32 1.0, %v145_v6 }
  0x92   :  { %v81_v9 = vadd.f32 1.0, %v147_v7 }
  0x93   :  { %148 = vrcp.f32 %v80_v8  ;;  %v93_v16 = vand.u32 2147483648, %v80_v8  ;;  %v91_v18 = vand.u32 2147483647, %v80_v8  ;;  %vm87_vm3 = vweird.f32 %v80_v8 }
  0x94   :  { %150 = vrcp.f32 %v81_v9  ;;  %v108_v19 = vand.u32 2147483648, %v81_v9  ;;  %v106_v21 = vand.u32 2147483647, %v81_v9  ;;  %vm102_vm5 = vweird.f32 %v81_v9 }
  0x95   :  { %v94_v23 = vor.u32 1.1754944e-38, %v93_v16  ;;  %vm92_vm7 = vcmp.eq.f32.partialorder %v91_v18, 8.507059e+37 }
  0x96   :  { %v109_v26 = vor.u32 1.1754944e-38, %v108_v19  ;;  %vm107_vm9 = vcmp.eq.f32.partialorder %v106_v21, 8.507059e+37 }
  0x99   :  { %v149_v10 = vpop.eup %148 }
  0x9a   :  { %v151_v11 = vpop.eup %150  ;;  %v83_v12 = vmul.f32 %v149_v10, %v80_v8  ;;  %vm88_vm1 = vweird.f32 %v149_v10 }
  0x9b   :  { %v98_v13 = vmul.f32 %v151_v11, %v81_v9  ;;  %vm103_vm2 = vweird.f32 %v151_v11  ;;  %vm89_vm4 = vmor %vm87_vm3, %vm88_vm1 }
  0x9c   :  { %v84_v14 = vsub.f32 1.0, %v83_v12  ;;  %vm104_vm8 = vmor %vm102_vm5, %vm103_vm2 }
  0x9d   :  { %v99_v15 = vsub.f32 1.0, %v98_v13 }
  0x9e   :  { %v85_v17 = vmul.f32 %v149_v10, %v84_v14 }
  0x9f   :  { %v100_v20 = vmul.f32 %v151_v11, %v99_v15 }
  0xa0   :  { %v86_v22 = vadd.f32 %v149_v10, %v85_v17 }
  0xa1   :  { %v101_v24 = vadd.f32 %v151_v11, %v100_v20 }
  0xa2   :  { %v90_v25 = vsel %vm89_vm4, %v149_v10, %v86_v22 }
  0xa3   :  { %v95_v27 = vsel %vm92_vm7, %v94_v23, %v90_v25  ;;  %v105_v28 = vsel %vm104_vm8, %v151_v11, %v101_v24 }
  0xa4   :  { %v110_v29 = vsel %vm107_vm9, %v109_v26, %v105_v28  ;;  %113 = vst.msk [vmem:[#allocation5] sm:$0xff] %vm112_vm6, %v95_v27 }
  0xa5   :  { %114 = vst.msk [vmem:[#allocation5 + $0x8] sm:$0xff] %vm112_vm6, %v110_v29 }
  0xa6   :  { %127 = dma.vmem_to_hbm [thread:$0]  %s120_s13, 256, %s122_s16, [#allocation4], %s205_s11, %s205_s11, %s206_s12  }
  0xa7   :  { %202 = dma.done.wait [#allocation4], 256  }
  0xa8   :  { %203 = vsyncadd [#allocation4], 4294967040 }
  0xa9   :  { %132 = vsyncpa [#allocation3], 1 }
  0xaa   :  { %133 = vsyncpa [#allocation4], 1 }

</bundles_post_ra>
